<compile_context>
chip_gen: v6e
topology: v6e:2x2x1
jax: 0.10.0
libtpu: 0.0.40
codegen_flags: <defaults>
</compile_context>

<pallas_src>
import functools

import jax
import jax.numpy as jnp
from jax import lax
from jax.experimental import pallas as pl
from jax.experimental.pallas import tpu as pltpu


def _vmem_physical_bytes():
    try:
        info = pltpu.get_tpu_info()
        cap = getattr(info, "vmem_capacity_bytes", None)
        if cap:
            return int(cap)
    except Exception:
        pass
    return 64 << 20  # conservative: v7x per-TensorCore VMEM


def _pick_b_tile(b, n_seg, S, x_itemsize, out_itemsize):
    """Batch rows per grid step.

    Co-constrained with the 128-lane chunk so the per-chunk vreg working set
    stays small, capped by a conservative double-buffered VMEM budget, and
    chosen so the 2-D output block stays legal ((8,128) rule)."""
    # (a) vreg working-set: ~2 live slabs of (b_tile*n_seg, 128) f32 <= ~32 vregs.
    cap_vreg = max(1, (64 * 1024) // (n_seg * 128 * 4))
    # (b) double-buffered input + output blocks under a ~24 MiB pipeline budget
    #     (safe on v5e/v6e 128 MiB and v7x 64 MiB VMEM).
    per_ex = 2 * n_seg * S * x_itemsize + 2 * S * out_itemsize
    cap_vmem = max(1, (24 * 1024 * 1024) // per_ex)
    cap = max(1, min(b, cap_vreg, cap_vmem))
    if cap >= b:
        # Whole batch per step (single-TC v5e/v6e prefer few, large steps);
        # split in two for the v7x megacore when the batch divides cleanly.
        if b >= 16 and b % 16 == 0:
            return b // 2
        return b
    # Largest multiple of 8 <= cap that divides b: keeps the (b_tile, S) output
    # block legal and avoids ragged trailing blocks.
    t = (cap // 8) * 8
    while t >= 8 and b % t:
        t -= 8
    if t >= 8:
        return t
    # TODO(synk): awkward batch sizes (no multiple-of-8 divisor <= cap) fall
    # back to the whole batch; the vmem limit below is sized for the real tile.
    return b


def _pick_s_chunk(S, b_tile, n_seg):
    """Lane chunk for streaming: multiple of 128, per-chunk load ~<= 64 KiB."""
    if S <= 128:
        return S
    budget = 64 * 1024
    c = (budget // (b_tile * n_seg * 4)) // 128 * 128
    c = max(128, min(c, 512))
    return min(c, (S // 128) * 128)


def _consensus_kernel(x_ref, w1t_ref, w2t_ref, o_ref, *,
                      b_tile, n_seg, S, s_chunk, inv_s):
    # x_ref  : (b_tile, n_seg, S)  VMEM, x dtype
    # w1t_ref: (n_seg, hidden)     VMEM f32 (fc1 weight, pre-transposed)
    # w2t_ref: (hidden, n_seg)     VMEM f32 (fc2 weight, pre-transposed)
    # o_ref  : (b_tile, S)         VMEM, output dtype (sublane-dense)
    f32 = jnp.float32
    n_full = S // s_chunk
    tail = S - n_full * s_chunk
    bn = b_tile * n_seg
    use_mxu = (n_seg % 8 == 0)   # (b_tile, n_seg, w) -> (bn, w) is a free reshape

    def load(start, width):
        return x_ref[:, :, pl.ds(start, width)].astype(f32)

    # ---- pass 1: per-(batch, segment) sums -------------------------------
    # Lane-wise accumulation (VPU adds) across chunks, one XLU reduce at end.
    if n_full <= 16:
        acc = load(0, s_chunk)
        for c in range(1, n_full):
            acc = acc + load(c * s_chunk, s_chunk)
    else:
        def p1_body(c, a):
            start = pl.multiple_of(c * s_chunk, s_chunk)
            return a + load(start, s_chunk)
        acc = lax.fori_loop(1, n_full, p1_body, load(0, s_chunk), unroll=4)
    sums = jnp.sum(acc, axis=-1)                       # (b_tile, n_seg)
    if tail:
        sums = sums + jnp.sum(load(n_full * s_chunk, tail), axis=-1)

    y = sums * inv_s                                   # mean over the real S

    # ---- tiny gating MLP + softmax (off the DMA-dominated critical path) ---
    h = jnp.dot(y, w1t_ref[...], preferred_element_type=f32,
                precision=lax.Precision.HIGHEST)
    h = jnp.maximum(h, 0.0)
    z = jnp.dot(h, w2t_ref[...], preferred_element_type=f32,
                precision=lax.Precision.HIGHEST)       # (b_tile, n_seg)
    z = z - jnp.max(z, axis=-1, keepdims=True)
    e = jnp.exp(z)
    w = e / jnp.sum(e, axis=-1, keepdims=True)         # (b_tile, n_seg)

    # ---- pass 2 setup (hoisted out of the chunk loop) -----------------------
    if use_mxu:
        # Block-diagonal (b_tile, b_tile*n_seg) softmax-weight matrix: one MXU
        # matmul per chunk lands the weighted sum in (b_tile, chunk) layout.
        ri = lax.broadcasted_iota(jnp.int32, (b_tile, n_seg), 0)
        blocks = [jnp.where(ri == k, w, 0.0) for k in range(b_tile)]
        w_bd = jnp.concatenate(blocks, axis=1) if b_tile > 1 else blocks[0]
    else:
        w3 = w.reshape(b_tile, n_seg, 1)

    # ---- pass 2: weighted segment sum, dense (b_tile, chunk) stores --------
    def emit(start, width):
        xc = load(start, width)                        # (b_tile, n_seg, width)
        if use_mxu:
            oc = jnp.dot(w_bd, xc.reshape(bn, width),
                         preferred_element_type=f32,
                         precision=lax.Precision.HIGHEST)   # (b_tile, width)
        else:
            oc = jnp.sum(xc * w3, axis=1)                    # (b_tile, width)
        o_ref[:, pl.ds(start, width)] = oc.astype(o_ref.dtype)

    if n_full <= 16:
        for c in range(n_full):
            emit(c * s_chunk, s_chunk)
    else:
        def p2_body(c, carry):
            emit(pl.multiple_of(c * s_chunk, s_chunk), s_chunk)
            return carry
        lax.fori_loop(0, n_full, p2_body, 0, unroll=4)
    if tail:
        emit(n_full * s_chunk, tail)


def temporal_consensus(x, w1, w2):
    """x: (b, n_seg, C, H, W); w1: (hidden, n_seg); w2: (n_seg, hidden).

    Returns (b, 1, C, H, W), matching TemporalConsensus.forward.
    """
    b, n_seg, C, H, W = x.shape
    hidden = w1.shape[0]
    S = C * H * W
    out_dtype = x.dtype

    # Free metadata reshape; x stays in its HBM dtype on the wire (the kernel
    # upcasts to f32 in vregs), and no padding copy is ever made.
    x_flat = x.reshape(b, n_seg, S)

    x_item = jnp.dtype(x.dtype).itemsize
    out_item = jnp.dtype(out_dtype).itemsize
    b_tile = _pick_b_tile(b, n_seg, S, x_item, out_item)
    s_chunk = _pick_s_chunk(S, b_tile, n_seg)
    grid = (b // b_tile,)

    # Pre-transpose the Linear weights in the wrapper -> plain row-major
    # matmuls in-kernel (no in-kernel transpose).
    w1t = jnp.asarray(w1, jnp.float32).T               # (n_seg, hidden)
    w2t = jnp.asarray(w2, jnp.float32).T               # (hidden, n_seg)

    kernel = functools.partial(
        _consensus_kernel, b_tile=b_tile, n_seg=n_seg, S=S,
        s_chunk=s_chunk, inv_s=1.0 / float(S))

    # Double-buffered input + output blocks + weights, with headroom; capped at
    # ~3/4 of this generation's physical VMEM (48 MiB on v7x).
    out_rows = max(b_tile, 8)                          # sublane padding of out block
    pipe_bytes = (2 * b_tile * n_seg * S * x_item
                  + 2 * out_rows * S * out_item
                  + 4 * n_seg * hidden * 4)
    vmem_limit = int(min(max(pipe_bytes + (8 << 20), 32 << 20),
                         _vmem_physical_bytes() * 3 // 4))

    cost = pl.CostEstimate(
        flops=int(3 * b * n_seg * S + 4 * b * n_seg * hidden),
        transcendentals=int(b * n_seg),
        bytes_accessed=int(b * n_seg * S * x_item + b * S * out_item
                           + 2 * n_seg * hidden * 4),
    )

    out_2d = pl.pallas_call(
        kernel,
        out_shape=jax.ShapeDtypeStruct((b, S), out_dtype),
        grid_spec=pltpu.PrefetchScalarGridSpec(
            num_scalar_prefetch=0,
            grid=grid,
            in_specs=[
                pl.BlockSpec((b_tile, n_seg, S), lambda i: (i, 0, 0)),
                pl.BlockSpec((n_seg, hidden), lambda i: (0, 0)),
                pl.BlockSpec((hidden, n_seg), lambda i: (0, 0)),
            ],
            out_specs=pl.BlockSpec((b_tile, S), lambda i: (i, 0)),
        ),
        compiler_params=pltpu.CompilerParams(
            dimension_semantics=("parallel",),
            vmem_limit_bytes=vmem_limit,
        ),
        cost_estimate=cost,
    )(x_flat, w1t, w2t)

    return out_2d.reshape(b, 1, C, H, W)


def reference(x, w1, w2):
    """Pure-JAX reference mirroring the PyTorch forward."""
    b, n_seg = x.shape[:2]
    y = jnp.mean(x, axis=(2, 3, 4))                              # (b, n_seg)
    y = jnp.maximum(jnp.dot(y, w1.T, precision=lax.Precision.HIGHEST), 0.0)
    y = jnp.dot(y, w2.T, precision=lax.Precision.HIGHEST)        # (b, n_seg)
    w = jax.nn.softmax(y, axis=1).reshape(b, n_seg, 1, 1, 1)
    return jnp.sum(x * w, axis=1, keepdims=True)                 # (b, 1, C, H, W)


if __name__ == "__main__":
    # Small shapes consistent with the module.
    b, n_seg, C, H, W = 2, 8, 4, 16, 16
    scale_rate = 0.5
    hidden = int(n_seg * scale_rate)                             # 4

    key = jax.random.PRNGKey(0)
    kx, k1, k2 = jax.random.split(key, 3)
    x = jax.random.normal(kx, (b, n_seg, C, H, W), dtype=jnp.float32)

    # Deterministic Linear weights (no bias), kaiming-uniform-like scale.
    bound1 = 1.0 / (n_seg ** 0.5)
    bound2 = 1.0 / (hidden ** 0.5)
    w1 = jax.random.uniform(k1, (hidden, n_seg), jnp.float32, -bound1, bound1)
    w2 = jax.random.uniform(k2, (n_seg, hidden), jnp.float32, -bound2, bound2)

    out = jax.block_until_ready(temporal_consensus(x, w1, w2))
    ref = reference(x, w1, w2)

    assert out.shape == (b, 1, C, H, W), out.shape
    err = float(jnp.max(jnp.abs(out - ref)))
    assert jnp.allclose(out, ref, atol=1e-4, rtol=1e-4), err
    print("KERNEL_OK")
</pallas_src>

<mosaic_0001>
module attributes {stable_mosaic.version = 11 : i64} {
  func.func @_consensus_kernel(%arg0: i32, %arg1: memref<2x8x1024xf32, #tpu.memory_space<vmem>>, %arg2: memref<8x4xf32, #tpu.memory_space<vmem>>, %arg3: memref<4x8xf32, #tpu.memory_space<vmem>>, %arg4: memref<2x1024xf32, #tpu.memory_space<vmem>>) attributes {dimension_semantics = [#tpu.dimension_semantics<parallel>], iteration_bounds = array<i64: 1>, scalar_prefetch = 0 : i64, scratch_operands = 0 : i64, tpu.core_type = #tpu.core_type<tc>, window_params = [{transform_indices = @transform_0, window_bounds = array<i64: 2, 8, 1024>}, {pipeline_mode = #tpu.pipeline_mode<synchronous>, transform_indices = @transform_1, window_bounds = array<i64: 8, 4>}, {pipeline_mode = #tpu.pipeline_mode<synchronous>, transform_indices = @transform_2, window_bounds = array<i64: 4, 8>}, {transform_indices = @transform_3, window_bounds = array<i64: 2, 1024>}]} {
    %c0 = arith.constant 0 : index
    %c0_0 = arith.constant 0 : index
    %c0_1 = arith.constant 0 : index
    %0 = vector.load %arg1[%c0, %c0_0, %c0_1] : memref<2x8x1024xf32, #tpu.memory_space<vmem>>, vector<2x8x512xf32>
    %c0_2 = arith.constant 0 : index
    %c0_3 = arith.constant 0 : index
    %c512 = arith.constant 512 : index
    %1 = vector.load %arg1[%c0_2, %c0_3, %c512] : memref<2x8x1024xf32, #tpu.memory_space<vmem>>, vector<2x8x512xf32>
    %2 = arith.addf %0, %1 : vector<2x8x512xf32>
    %cst = arith.constant dense<0.000000e+00> : vector<2x8xf32>
    %3 = vector.multi_reduction <add>, %2, %cst [2] : vector<2x8x512xf32> to vector<2x8xf32>
    %cst_4 = arith.constant 9.765625E-4 : f32
    %4 = vector.broadcast %cst_4 : f32 to vector<2x8xf32>
    %5 = arith.mulf %3, %4 : vector<2x8xf32>
    %c0_5 = arith.constant 0 : index
    %c0_6 = arith.constant 0 : index
    %6 = vector.load %arg2[%c0_5, %c0_6] : memref<8x4xf32, #tpu.memory_space<vmem>>, vector<8x4xf32>
    %cst_7 = arith.constant dense<0.000000e+00> : vector<2x4xf32>
    %7 = tpu.matmul %5, %6, %cst_7 {dimension_numbers = #tpu.dot_dimension_numbers<[1], [0], [0], [1], [0, 0, 1, 1], [], []>, precision = #tpu.contract_precision<fp32>} : vector<2x8xf32>, vector<8x4xf32>, vector<2x4xf32> -> vector<2x4xf32>
    %cst_8 = arith.constant 0.000000e+00 : f32
    %8 = vector.broadcast %cst_8 : f32 to vector<2x4xf32>
    %9 = arith.maximumf %7, %8 : vector<2x4xf32>
    %c0_9 = arith.constant 0 : index
    %c0_10 = arith.constant 0 : index
    %10 = vector.load %arg3[%c0_9, %c0_10] : memref<4x8xf32, #tpu.memory_space<vmem>>, vector<4x8xf32>
    %cst_11 = arith.constant dense<0.000000e+00> : vector<2x8xf32>
    %11 = tpu.matmul %9, %10, %cst_11 {dimension_numbers = #tpu.dot_dimension_numbers<[1], [0], [0], [1], [0, 0, 1, 1], [], []>, precision = #tpu.contract_precision<fp32>} : vector<2x4xf32>, vector<4x8xf32>, vector<2x8xf32> -> vector<2x8xf32>
    %cst_12 = arith.constant dense<0xFF800000> : vector<2xf32>
    %12 = vector.multi_reduction <maximumf>, %11, %cst_12 [1] : vector<2x8xf32> to vector<2xf32>
    %13 = vector.shape_cast %12 : vector<2xf32> to vector<2x1xf32>
    %14 = vector.broadcast %13 : vector<2x1xf32> to vector<2x8xf32>
    %15 = arith.subf %11, %14 : vector<2x8xf32>
    %16 = math.exp %15 : vector<2x8xf32>
    %cst_13 = arith.constant dense<0.000000e+00> : vector<2xf32>
    %17 = vector.multi_reduction <add>, %16, %cst_13 [1] : vector<2x8xf32> to vector<2xf32>
    %18 = vector.shape_cast %17 : vector<2xf32> to vector<2x1xf32>
    %19 = vector.broadcast %18 : vector<2x1xf32> to vector<2x8xf32>
    %20 = arith.divf %16, %19 : vector<2x8xf32>
    %21 = tpu.iota {dimensions = array<i32: 0>} : vector<2x8xi32>
    %c0_i32 = arith.constant 0 : i32
    %22 = vector.broadcast %c0_i32 : i32 to vector<2x8xi32>
    %23 = arith.cmpi eq, %21, %22 : vector<2x8xi32>
    %cst_14 = arith.constant 0.000000e+00 : f32
    %24 = vector.broadcast %cst_14 : f32 to vector<2x8xf32>
    %25 = arith.select %23, %20, %24 : vector<2x8xi1>, vector<2x8xf32>
    %c1_i32 = arith.constant 1 : i32
    %26 = vector.broadcast %c1_i32 : i32 to vector<2x8xi32>
    %27 = arith.cmpi eq, %21, %26 : vector<2x8xi32>
    %cst_15 = arith.constant 0.000000e+00 : f32
    %28 = vector.broadcast %cst_15 : f32 to vector<2x8xf32>
    %29 = arith.select %27, %20, %28 : vector<2x8xi1>, vector<2x8xf32>
    %30 = tpu.concatenate %25, %29 in 1 : vector<2x8xf32>, vector<2x8xf32> -> vector<2x16xf32>
    %c0_16 = arith.constant 0 : index
    %c0_17 = arith.constant 0 : index
    %c0_18 = arith.constant 0 : index
    %31 = vector.load %arg1[%c0_16, %c0_17, %c0_18] : memref<2x8x1024xf32, #tpu.memory_space<vmem>>, vector<2x8x512xf32>
    %32 = vector.shape_cast %31 : vector<2x8x512xf32> to vector<16x512xf32>
    %cst_19 = arith.constant dense<0.000000e+00> : vector<2x512xf32>
    %33 = tpu.matmul %30, %32, %cst_19 {dimension_numbers = #tpu.dot_dimension_numbers<[1], [0], [0], [1], [0, 0, 1, 1], [], []>, precision = #tpu.contract_precision<fp32>} : vector<2x16xf32>, vector<16x512xf32>, vector<2x512xf32> -> vector<2x512xf32>
    %c0_20 = arith.constant 0 : index
    %c0_21 = arith.constant 0 : index
    %34 = vector.load %arg4[%c0_20, %c0_21] : memref<2x1024xf32, #tpu.memory_space<vmem>>, vector<2x512xf32>
    tpu.vector_store %arg4[%c0_20, %c0_21], %33 {strides = array<i32>} : memref<2x1024xf32, #tpu.memory_space<vmem>>, vector<2x512xf32>,
    %c0_22 = arith.constant 0 : index
    %c0_23 = arith.constant 0 : index
    %c512_24 = arith.constant 512 : index
    %35 = vector.load %arg1[%c0_22, %c0_23, %c512_24] : memref<2x8x1024xf32, #tpu.memory_space<vmem>>, vector<2x8x512xf32>
    %36 = vector.shape_cast %35 : vector<2x8x512xf32> to vector<16x512xf32>
    %cst_25 = arith.constant dense<0.000000e+00> : vector<2x512xf32>
    %37 = tpu.matmul %30, %36, %cst_25 {dimension_numbers = #tpu.dot_dimension_numbers<[1], [0], [0], [1], [0, 0, 1, 1], [], []>, precision = #tpu.contract_precision<fp32>} : vector<2x16xf32>, vector<16x512xf32>, vector<2x512xf32> -> vector<2x512xf32>
    %c0_26 = arith.constant 0 : index
    %c512_27 = arith.constant 512 : index
    %38 = vector.load %arg4[%c0_26, %c512_27] : memref<2x1024xf32, #tpu.memory_space<vmem>>, vector<2x512xf32>
    tpu.vector_store %arg4[%c0_26, %c512_27], %37 {strides = array<i32>} : memref<2x1024xf32, #tpu.memory_space<vmem>>, vector<2x512xf32>,
    return
  }
  func.func @transform_0(%arg0: i32) -> (i32, i32, i32) {
    %c0_i32 = arith.constant 0 : i32
    %c0_i32_0 = arith.constant 0 : i32
    %c0_i32_1 = arith.constant 0 : i32
    return %arg0, %c0_i32, %c0_i32_0 : i32, i32, i32
  }
  func.func @transform_1(%arg0: i32) -> (i32, i32) {
    %c0_i32 = arith.constant 0 : i32
    %c0_i32_0 = arith.constant 0 : i32
    %c0_i32_1 = arith.constant 0 : i32
    return %c0_i32, %c0_i32_0 : i32, i32
  }
  func.func @transform_2(%arg0: i32) -> (i32, i32) {
    %c0_i32 = arith.constant 0 : i32
    %c0_i32_0 = arith.constant 0 : i32
    %c0_i32_1 = arith.constant 0 : i32
    return %c0_i32, %c0_i32_0 : i32, i32
  }
  func.func @transform_3(%arg0: i32) -> (i32, i32) {
    %c0_i32 = arith.constant 0 : i32
    %c0_i32_0 = arith.constant 0 : i32
    return %arg0, %c0_i32 : i32, i32
  }
}

</mosaic_0001>

<bundles_post_ra>
// kernel: tpu_custom_call.1
= control target key start
LH: loop header
LB: loop body
LE: loop exit
PB: predicated region body
PF: predicated region fallthrough
CT: control target
= control target key end

     0   :  { %8 = vsyncpa [#allocation3], 0  ;;  %s3649_s0 = inlined_call_operand.hbm [shape: f32[2,8,1024], index: 0, kind: input, shape index: {}]   ;;  %s3650_s1 = inlined_call_operand.vmem [shape: f32[8,4], index: 1, kind: input, shape index: {}]   ;;  %s3651_s2 = inlined_call_operand.vmem [shape: f32[4,8], index: 2, kind: input, shape index: {}]   ;;  %s3652_s3 = inlined_call_operand.hbm [shape: f32[2,1024], index: 3, kind: output, shape index: {}]  }
   0x1   :  { %9 = vsyncpa [#allocation4], 0  ;;  %s3185_s12 = smov [#allocation2]  }
   0x2   :  { %s15_s13 = sshll.u32 %s3185_s12, 4  ;;  %s16_s13 = int_to_ptr.vmem [resolvable:$true] %s15_s13 }
   0x3   :  { %s3149_s14 = scalar_lea.vmem %s16_s13, 2048  ;;  %p3154_p1 = scmp.lt.s32.totalorder %s16_s13, %s16_s13 }
   0x4   :  { %p3150_p0 = scmp.ne.s32.totalorder %s16_s13, %s3149_s14  ;;  %p3155_p2 = scmp.lt.s32.totalorder %s3149_s14, %s3149_s14 }
   0x6   :  { %p3156_p3 = por %p3155_p2, %p3154_p1 }
   0x8   :  { %p3157_p4 = pnand %p3156_p3, %p3150_p0 }
   0xa   :  { %3160 = shalt.err (!%p3157_p4)
}
   0xb   :  { %s3186_s15 = smov 1024   ;;  %s3187_s16 = smov 64  }
   0xc   :  { %21 = dma.hbm_to_vmem [thread:$0]  %s3649_s0, 2048, %s16_s13, [#allocation3], %s3186_s15, %s3186_s15, %s3187_s16  }
   0xd   :  { %3181 = dma.done.wait [#allocation3], 2048  }
   0xe   :  { %3182 = vsyncadd [#allocation3], 4294965248  ;;  %v3216_v0 = vld [vmem:[#allocation2] sm:$0xff]  ;;  %v3218_v1 = vld [vmem:[#allocation2 + $0x8] sm:$0xff]  ;;  %v3188_v36 = vmov 0.0   ;;  %vm3189_vm0 = vmmov 0   ;;  %v68_v37 = vlaneseq }
   0xf   :  { %v3220_v2 = vld [vmem:[#allocation2 + $0x10] sm:$0xff]  ;;  %v3222_v3 = vld [vmem:[#allocation2 + $0x18] sm:$0xff]  ;;  %v3224_v4 = vld [vmem:[#allocation2 + $0x20] sm:$0xff]  ;;  %3074 = vmatprep.subr.mxu1 %v3188_v36  ;;  %3076 = vmatprep.mubr.msk.f32.mxu1 %vm3189_vm0, %v3188_v36  ;;  %vm78_vm1 = vcmask 1041409   ;;  %vm80_vm2 = vcmask 64512   ;;  %vm535_vm3 = vcmask 1043456  }
  0x10   :  { %v3226_v5 = vld [vmem:[#allocation2 + $0x28] sm:$0xff]  ;;  %v3228_v6 = vld [vmem:[#allocation2 + $0x30] sm:$0xff]  ;;  %v3230_v7 = vld [vmem:[#allocation2 + $0x38] sm:$0xff]  ;;  %v45_v8 = vadd.f32 %v3224_v4, %v3216_v0  ;;  %3069 = vmatprep.subr.mxu0 %v3188_v36  ;;  %3071 = vmatprep.mubr.msk.f32.mxu0 %vm3189_vm0, %v3188_v36  ;;  %v69_v38 = vand.u32 127, %v68_v37  ;;  %v3275_v39 = vshrl.u32 %v68_v37, 7  ;;  %vm531_vm4 = vcmask 31744  }
  0x11   :  { %v46_v9 = vadd.f32 %v3226_v5, %v3218_v1  ;;  %v3236_v10 = vld [vmem:[#allocation2 + $0x40] sm:$0xff]  ;;  %v47_v11 = vadd.f32 %v3228_v6, %v3220_v2  ;;  %v3240_v12 = vld [vmem:[#allocation2 + $0x48] sm:$0xff]  ;;  %v3242_v13 = vld [vmem:[#allocation2 + $0x50] sm:$0xff]  ;;  %v48_v15 = vadd.f32 %v3230_v7, %v3222_v3  ;;  %vm985_vm5 = vcmask 58368   ;;  %s3192_s21 = smov [#allocation5]  }
  0x12   :  { %v3244_v14 = vld [vmem:[#allocation2 + $0x58] sm:$0xff]  ;;  %v3248_v17 = vld [vmem:[#allocation2 + $0x60] sm:$0xff]  ;;  %v3250_v18 = vld [vmem:[#allocation2 + $0x68] sm:$0xff]  ;;  %v72_v41 = vsub.s32 %v69_v38, %v3275_v39  ;;  %v3310_v38 = vand.u32 4294901760, %v3240_v12  ;;  %vm1001_vm6 = vcmp.eq.s32.totalorder %v3275_v39, 1  ;;  %vm999_vm7 = vcmp.eq.s32.totalorder %v3275_v39, 0 }
  0x13   :  { %v53_v16 = vadd.f32 %v46_v9, %v45_v8  ;;  %v3252_v19 = vld [vmem:[#allocation2 + $0x70] sm:$0xff]  ;;  %v3254_v20 = vld [vmem:[#allocation2 + $0x78] sm:$0xff]  ;;  %v49_v21 = vadd.f32 %v3248_v17, %v3236_v10  ;;  %v50_v22 = vadd.f32 %v3250_v18, %v3240_v12  ;;  %v65_v30 = vld [vmem:[%s3650_s1] sm:$0xff]  ;;  %vm1008_vm8 = vcmask 130048   ;;  %s3036_s22 = sshll.u32 %s3192_s21, 4  ;;  %s3037_s22 = int_to_ptr.vmem [resolvable:$true] %s3036_s22 }
  0x14   :  { %v51_v23 = vadd.f32 %v3252_v19, %v3242_v13  ;;  %v52_v25 = vadd.f32 %v3254_v20, %v3244_v14  ;;  %v114_v31 = vand.u32 4294901760, %v65_v30  ;;  %v530_v54 = vld [vmem:[%s3651_s2] sm:$0xf]  ;;  %s3190_s2 = smov 8   ;;  %s3161_s23 = scalar_lea.vmem %s3037_s22, 256 }
  0x15   :  { %v54_v24 = vadd.f32 %v53_v16, %v47_v11  ;;  %v58_v26 = vadd.f32 %v50_v22, %v49_v21  ;;  %v537_v55 = vsel %vm535_vm3, %v530_v54, 0  ;;  %p3162_p5 = scmp.ne.s32.totalorder %s3037_s22, %s3161_s23  ;;  %p3166_p6 = scmp.lt.s32.totalorder %s3037_s22, %s3037_s22 }
  0x16   :  { %v191_v32 = vsub.f32 %v65_v30, %v114_v31  ;;  %3070 = vmatpush3.msra.mxu0 %v114_v31  ;;  %v570_v56 = vand.u32 4294901760, %v537_v55  ;;  %p3167_p7 = scmp.lt.s32.totalorder %s3161_s23, %s3161_s23 }
  0x17   :  { %v55_v27 = vadd.f32 %v54_v24, %v48_v15  ;;  %v59_v28 = vadd.f32 %v58_v26, %v51_v23  ;;  %3079 = vmatprep.subr.mxu0 %v3188_v36 }
  0x18   :  { %v192_v33 = vand.u32 4294901760, %v191_v32  ;;  %v647_v57 = vsub.f32 %v537_v55, %v570_v56  ;;  %p3168_p8 = por %p3167_p7, %p3166_p6 }
  0x19   :  { %56 = vadd.xlane.f32.xlu0 %v55_v27  ;;  %v60_v29 = vadd.f32 %v59_v28, %v52_v25 }
  0x1a   :  { %v193_v34 = vsub.f32 %v191_v32, %v192_v33  ;;  %v648_v58 = vand.u32 4294901760, %v647_v57  ;;  %p3169_p9 = pnand %p3168_p8, %p3162_p5 }
  0x1c   :  { %v194_v35 = vand.u32 4294901760, %v193_v34  ;;  %v649_v59 = vsub.f32 %v647_v57, %v648_v58 }
  0x1d   :  { %61 = vadd.xlane.f32.xlu0 %v60_v29 }
  0x1e   :  { %3075 = vmatpush3.msra.mxu1 %v194_v35  ;;  %v650_v60 = vand.u32 4294901760, %v649_v59 }
  0x1f   :  { %3084 = vmatprep.subr.mxu1 %v3188_v36 }
  0xa2   :  { %v57_v40 = vpop.xlane.xlu0 %56 }
  0xa3   :  { %v63_v42 = vmul.f32 0.0009765625, %v57_v40  ;;  %v3316_v40 = vand.u32 4294901760, %v3236_v10 }
  0xa5   :  { %v73_v45 = vrot.slane %v63_v42, %v72_v41  ;;  %v3322_v42 = vand.u32 4294901760, %v3216_v0 }
  0xa6   :  { %v62_v43 = vpop.xlane.xlu0 %61 }
  0xa7   :  { %v64_v44 = vmul.f32 0.0009765625, %v62_v43 }
  0xa9   :  { %v77_v46 = vrot.slane %v64_v44, %v72_v41  ;;  %v3319_v41 = vand.u32 4294901760, %v3218_v1 }
  0xab   :  { %v79_v47 = vsel %vm78_vm1, %v77_v46, %v73_v45 }
  0xac   :  { %v81_v48 = vsel %vm80_vm2, %v79_v47, 0 }
  0xad   :  { %v149_v49 = vand.u32 4294901760, %v81_v48 }
  0xaf   :  { %3077 = vmatmul.mubr.f32.vlgmr.msra.gmra.mxu1 %v149_v49  ;;  %v150_v50 = vsub.f32 %v81_v48, %v149_v49 }
  0xb0   :  { %3085 = vmatpush3.msra.mxu1 %v114_v31  ;;  %3086 = vmatprep.mubr.msk.f32.mxu1 %vm3189_vm0, %v3188_v36 }
  0xb1   :  { %v151_v51 = vand.u32 4294901760, %v150_v50  ;;  %3094 = vmatprep.subr.mxu1 %v3188_v36 }
  0xb3   :  { %3087 = vmatmul.mubr.f32.vlgmr.msra.gmra.mxu1 %v151_v51  ;;  %v152_v52 = vsub.f32 %v150_v50, %v151_v51 }
  0xb4   :  { %3095 = vmatpush3.msra.mxu1 %v114_v31  ;;  %3096 = vmatprep.mubr.msk.f32.mxu1 %vm3189_vm0, %v3188_v36 }
  0xb5   :  { %v153_v53 = vand.u32 4294901760, %v152_v52  ;;  %3104 = vmatprep.subr.mxu1 %v3188_v36 }
  0xb7   :  { %3072 = vmatmul.mubr.f32.vlgmr.msra.gmra.mxu0 %v153_v53  ;;  %3097 = vmatmul.mubr.f32.vlgmr.msra.gmra.mxu1 %v149_v49 }
  0xb8   :  { %3080 = vmatpush3.msra.mxu0 %v191_v32  ;;  %3081 = vmatprep.mubr.msk.f32.mxu0 %vm3189_vm0, %v3188_v36 }
  0xb9   :  { %3089 = vmatprep.subr.mxu0 %v3188_v36  ;;  %3106 = vmatprep.mubr.msk.f32.mxu1 %vm3189_vm0, %v3188_v36 }
  0xba   :  { %3105 = vmatpush3.msra.mxu1 %v650_v60 }
  0xbb   :  { %3082 = vmatmul.mubr.f32.vlgmr.msra.gmra.mxu0 %v150_v50  ;;  %3114 = vmatprep.subr.mxu1 %v3188_v36 }
  0xbc   :  { %3090 = vmatpush3.msra.mxu0 %v192_v33  ;;  %3091 = vmatprep.mubr.msk.f32.mxu0 %vm3189_vm0, %v3188_v36 }
  0xbd   :  { %3099 = vmatprep.subr.mxu0 %v3188_v36 }
  0xbf   :  { %3092 = vmatmul.mubr.f32.vlgmr.msra.gmra.mxu0 %v149_v49 }
  0xc0   :  { %3101 = vmatprep.mubr.msk.f32.mxu0 %vm3189_vm0, %v3188_v36  ;;  %3100 = vmatpush3.msra.mxu0 %v570_v56 }
  0xc1   :  { %3109 = vmatprep.subr.mxu0 %v3188_v36 }
 0x16f   :  { %v231_v61 = vpop.f32.mrf.mxu1 }
 0x171   :  { %v3078_v62 = vpop.f32.mrf.mxu1 }
 0x173   :  { %v379_v63 = vpop.f32.mrf.mxu1 }
 0x175   :  { %v3088_v8 = vpop.f32.mrf.mxu1 }
 0x177   :  { %v155_v9 = vpop.f32.mrf.mxu0  ;;  %v525_v11 = vpop.f32.mrf.mxu1 }
 0x178   :  { %v232_v21 = vadd.f32 %v231_v61, %v155_v9 }
 0x179   :  { %v3073_v15 = vpop.f32.mrf.mxu0  ;;  %v3098_v16 = vpop.f32.mrf.mxu1 }
 0x17a   :  { %v3334_v15 = vsub.f32 %v3240_v12, %v3310_v38  ;;  %v3338_v16 = vsub.f32 %v3216_v0, %v3322_v42 }
 0x17b   :  { %v305_v22 = vpop.f32.mrf.mxu0 }
 0x17c   :  { %v306_v23 = vadd.f32 %v305_v22, %v232_v21  ;;  %v1122_v21 = vand.u32 4294901760, %v3334_v15  ;;  %v3343_v22 = vsub.f32 %v3218_v1, %v3319_v41 }
 0x17d   :  { %v3083_v24 = vpop.f32.mrf.mxu0 }
 0x17e   :  { %v380_v25 = vadd.f32 %v379_v63, %v306_v23  ;;  %v1123_v12 = vsub.f32 %v3334_v15, %v1122_v21  ;;  %v1134_v24 = vand.u32 4294901760, %v3343_v22 }
 0x17f   :  { %v453_v26 = vpop.f32.mrf.mxu0 }
 0x180   :  { %v454_v27 = vadd.f32 %v453_v26, %v380_v25  ;;  %v1140_v25 = vand.u32 4294901760, %v3338_v16  ;;  %v1124_v1 = vand.u32 4294901760, %v1123_v12  ;;  %v1135_v26 = vsub.f32 %v3343_v22, %v1134_v24 }
 0x181   :  { %v3093_v28 = vpop.f32.mrf.mxu0 }
 0x182   :  { %v526_v29 = vadd.f32 %v525_v11, %v454_v27  ;;  %v3330_v11 = vsub.f32 %v3236_v10, %v3316_v40  ;;  %v1141_v28 = vsub.f32 %v3338_v16, %v1140_v25 }
 0x184   :  { %v529_v30 = vmax.f32 %v526_v29, 0.0  ;;  %v1128_v10 = vand.u32 4294901760, %v3330_v11  ;;  %v1136_v29 = vand.u32 4294901760, %v1135_v26 }
 0x186   :  { %v533_v31 = vsel %vm531_vm4, %v529_v30, 0  ;;  %v1129_v0 = vsub.f32 %v3330_v11, %v1128_v10  ;;  %v1142_v30 = vand.u32 4294901760, %v1141_v28 }
 0x187   :  { %v605_v32 = vand.u32 4294901760, %v533_v31 }
 0x188   :  { %v1130_v27 = vand.u32 4294901760, %v1129_v0 }
 0x189   :  { %v606_v33 = vsub.f32 %v533_v31, %v605_v32  ;;  %3107 = vmatmul.mubr.f32.vlgmr.msra.gmra.mxu1 %v605_v32 }
 0x18a   :  { %3115 = vmatpush3.msra.mxu1 %v570_v56  ;;  %3116 = vmatprep.mubr.msk.f32.mxu1 %vm3189_vm0, %v3188_v36 }
 0x18b   :  { %v607_v34 = vand.u32 4294901760, %v606_v33  ;;  %3124 = vmatprep.subr.mxu1 %v3188_v36 }
 0x18d   :  { %3117 = vmatmul.mubr.f32.vlgmr.msra.gmra.mxu1 %v607_v34  ;;  %v608_v35 = vsub.f32 %v606_v33, %v607_v34  ;;  %v3364_v34 = vand.u32 4294901760, %v3244_v14 }
 0x18e   :  { %3125 = vmatpush3.msra.mxu1 %v570_v56  ;;  %3126 = vmatprep.mubr.msk.f32.mxu1 %vm3189_vm0, %v3188_v36 }
 0x18f   :  { %v609_v37 = vand.u32 4294901760, %v608_v35  ;;  %1125 = vmatprep.subr.mxu1 %v1124_v1  ;;  %v3367_v35 = vand.u32 4294901760, %v3242_v13  ;;  %v3518_v1 = vand.u32 4294901760, %v3252_v19 }
 0x191   :  { %3102 = vmatmul.mubr.f32.vlgmr.msra.gmra.mxu0 %v609_v37  ;;  %3127 = vmatmul.mubr.f32.vlgmr.msra.gmra.mxu1 %v605_v32  ;;  %v3370_v37 = vand.u32 4294901760, %v3222_v3 }
 0x192   :  { %3110 = vmatpush3.msra.mxu0 %v647_v57  ;;  %3111 = vmatprep.mubr.msk.f32.mxu0 %vm3189_vm0, %v3188_v36 }
 0x193   :  { %3119 = vmatprep.subr.mxu0 %v3188_v36  ;;  %1176 = vmatprep.mubr.f32.mxu1 %v3188_v36 }
 0x194   :  { %1131 = vmatpush1.msra.mxu1 %v1130_v27  ;;  %v3522_v27 = vand.u32 4294901760, %v3230_v7 }
 0x195   :  { %3112 = vmatmul.mubr.f32.vlgmr.msra.gmra.mxu0 %v606_v33  ;;  %1137 = vmatprep.subr.mxu1 %v1136_v29  ;;  %v3531_v29 = vand.u32 4294901760, %v3228_v6 }
 0x196   :  { %3120 = vmatpush3.msra.mxu0 %v648_v58  ;;  %3121 = vmatprep.mubr.msk.f32.mxu0 %vm3189_vm0, %v3188_v36 }
 0x197   :  { %1041 = vmatprep.subr.mxu0 %v3310_v38  ;;  %1143 = vmatpush1.msra.mxu1 %v1142_v30  ;;  %v3538_v30 = vsub.f32 %v3252_v19, %v3518_v1  ;;  %v3553_v19 = vsub.f32 %v3228_v6, %v3531_v29 }
 0x198   :  { %1294 = vmatprep.subr.mxu1 %v3310_v38 }
 0x199   :  { %3122 = vmatmul.mubr.f32.vlgmr.msra.gmra.mxu0 %v605_v32 }
 0x19a   :  { %1043 = vmatpush1.msra.mxu0 %v3316_v40  ;;  %1080 = vmatprep.mubr.f32.mxu0 %v3188_v36 }
 0x19b   :  { %1045 = vmatprep.subr.mxu0 %v3319_v41 }
 0x19c   :  { %1047 = vmatpush1.msra.mxu0 %v3322_v42 }
 0x19d   :  { %1214 = vmatprep.subr.mxu0 %v3334_v15 }
 0x249   :  { %v687_v43 = vpop.f32.mrf.mxu1 }
 0x24b   :  { %v3108_v44 = vpop.f32.mrf.mxu1 }
 0x24c   :  { %v3378_v44 = vsub.f32 %v3244_v14, %v3364_v34 }
 0x24d   :  { %v835_v45 = vpop.f32.mrf.mxu1 }
 0x24e   :  { %v1613_v14 = vand.u32 4294901760, %v3378_v44 }
 0x24f   :  { %v3118_v46 = vpop.f32.mrf.mxu1 }
 0x250   :  { %v3386_v46 = vsub.f32 %v3222_v3, %v3370_v37 }
 0x251   :  { %v611_v47 = vpop.f32.mrf.mxu0  ;;  %v981_v48 = vpop.f32.mrf.mxu1 }
 0x252   :  { %v688_v51 = vadd.f32 %v687_v43, %v611_v47  ;;  %v3374_v43 = vand.u32 4294901760, %v3220_v2 }
 0x253   :  { %v3103_v49 = vpop.f32.mrf.mxu0  ;;  %v3128_v50 = vpop.f32.mrf.mxu1 }
 0x254   :  { %v3391_v50 = vsub.f32 %v3220_v2, %v3374_v43  ;;  %v1614_v2 = vsub.f32 %v3378_v44, %v1613_v14 }
 0x255   :  { %v761_v52 = vpop.f32.mrf.mxu0 }
 0x256   :  { %v762_v53 = vadd.f32 %v761_v52, %v688_v51 }
 0x257   :  { %v3113_v54 = vpop.f32.mrf.mxu0 }
 0x258   :  { %v836_v55 = vadd.f32 %v835_v45, %v762_v53  ;;  %v3382_v45 = vsub.f32 %v3242_v13, %v3367_v35  ;;  %v1625_v53 = vand.u32 4294901760, %v3386_v46  ;;  %v1631_v54 = vand.u32 4294901760, %v3391_v50 }
 0x259   :  { %v909_v56 = vpop.f32.mrf.mxu0 }
 0x25a   :  { %v910_v57 = vadd.f32 %v909_v56, %v836_v55  ;;  %v1619_v13 = vand.u32 4294901760, %v3382_v45 }
 0x25b   :  { %v3123_v58 = vpop.f32.mrf.mxu0 }
 0x25c   :  { %v982_v59 = vadd.f32 %v981_v48, %v910_v57  ;;  %v1620_v56 = vsub.f32 %v3382_v45, %v1619_v13  ;;  %v1626_v57 = vsub.f32 %v3386_v46, %v1625_v53 }
 0x25e   :  { %v986_v60 = vsel %vm985_vm5, %v982_v59, -inf }
 0x25f   :  { %987 = vmax.xlane.f32.xlu1 %v986_v60  ;;  %v1632_v60 = vsub.f32 %v3391_v50, %v1631_v54 }
 0x2e8   :  { %v988_v61 = vpop.xlane.xlu1 %987 }
 0x2e9   :  { %v989_v62 = vsub.f32 %v982_v59, %v988_v61  ;;  %v1615_v59 = vand.u32 4294901760, %v1614_v2 }
 0x2eb   :  { %v990_v63 = vmul.f32 1.442695, %v989_v62  ;;  %v1621_v62 = vand.u32 4294901760, %v1620_v56 }
 0x2ed   :  { %3137 = vpow2.f32 %v990_v63  ;;  %v3433_v63 = vand.u32 4294901760, %v3250_v18 }
 0x2fa   :  { %v3138_v8 = vpop.eup %3137 }
 0x2fb   :  { %v992_v9 = vsel %vm985_vm5, %v3138_v8, 0.0 }
 0x2fc   :  { %993 = vadd.xlane.f32.xlu1 %v992_v9  ;;  %v3451_v9 = vand.u32 4294901760, %v3224_v4 }
 0x385   :  { %v994_v23 = vpop.xlane.xlu1 %993 }
 0x386   :  { %3139 = vrcp.f32 %v994_v23 }
 0x393   :  { %v3140_v31 = vpop.eup %3139 }
 0x394   :  { %v996_v32 = vmul.f32 %v3140_v31, %v3138_v8  ;;  %v3442_v8 = vand.u32 4294901760, %v3226_v5  ;;  %v3543_v31 = vsub.f32 %v3230_v7, %v3522_v27  ;;  %v2632_v7 = vand.u32 4294901760, %v3538_v30 }
 0x396   :  { %v1002_v33 = vsel %vm1001_vm6, %v996_v32, 0.0  ;;  %v1000_v48 = vsel %vm999_vm7, %v996_v32, 0.0  ;;  %v3463_v12 = vsub.f32 %v3226_v5, %v3442_v8  ;;  %v2638_v32 = vand.u32 4294901760, %v3543_v31 }
 0x397   :  { %1004 = vrot.lane.b32.xlu0 %v1002_v33, %s3190_s2  ;;  %v2644_v33 = vand.u32 4294901760, %v3553_v19 }
 0x409   :  { %v1005_v47 = vpop.permute.xlu0 %1004 }
 0x40a   :  { %v1007_v49 = vsel %vm80_vm2, %v1000_v48, %v1005_v47 }
 0x40b   :  { %v1010_v51 = vsel %vm1008_vm8, %v1007_v49, 0 }
 0x40c   :  { %v3394_v52 = vand.u32 4294901760, %v1010_v51 }
 0x40e   :  { %v3399_v3 = vsub.f32 %v1010_v51, %v3394_v52  ;;  %1178 = vmatmul.mubr.f32.vlgmr.msra.gmra.mxu1 %v3394_v52 }
 0x40f   :  { %1296 = vmatpush1.msra.mxu1 %v3316_v40  ;;  %1333 = vmatprep.mubr.f32.mxu1 %v3188_v36 }
 0x410   :  { %1298 = vmatprep.subr.mxu1 %v3319_v41  ;;  %v3410_v55 = vand.u32 4294901760, %v3399_v3 }
 0x411   :  { %1300 = vmatpush1.msra.mxu1 %v3322_v42 }
 0x412   :  { %1337 = vmatmul.mubr.f32.vlgmr.msra.gmra.mxu1 %v3410_v55  ;;  %1456 = vmatprep.subr.mxu1 %v3310_v38  ;;  %v1084_v58 = vsub.f32 %v3399_v3, %v3410_v55  ;;  %v1627_v38 = vand.u32 4294901760, %v1626_v57 }
 0x413   :  { %1458 = vmatpush1.msra.mxu1 %v3316_v40  ;;  %1495 = vmatprep.mubr.f32.mxu1 %v3188_v36  ;;  %v3438_v40 = vand.u32 4294901760, %v3248_v17 }
 0x414   :  { %1460 = vmatprep.subr.mxu1 %v3319_v41  ;;  %v3429_v61 = vand.u32 4294901760, %v1084_v58  ;;  %v1633_v41 = vand.u32 4294901760, %v1632_v60 }
 0x415   :  { %1462 = vmatpush1.msra.mxu1 %v3322_v42  ;;  %v3448_v42 = vsub.f32 %v3250_v18, %v3433_v63  ;;  %v3458_v23 = vsub.f32 %v3248_v17, %v3438_v40  ;;  %v3473_v17 = vsub.f32 %v3224_v4, %v3451_v9 }
 0x416   :  { %1086 = vmatmul.mubr.f32.vlgmr.msra.gmra.mxu0 %v3429_v61  ;;  %1497 = vmatmul.mubr.f32.vlgmr.msra.gmra.mxu1 %v3394_v52 }
 0x417   :  { %1217 = vmatpush1.msra.mxu0 %v3330_v11  ;;  %1616 = vmatprep.subr.mxu1 %v1615_v59  ;;  %v2135_v18 = vand.u32 4294901760, %v3448_v42  ;;  %v2141_v5 = vand.u32 4294901760, %v3458_v23  ;;  %v2147_v11 = vand.u32 4294901760, %v3463_v12  ;;  %v2153_v15 = vand.u32 4294901760, %v3473_v17 }
 0x418   :  { %1220 = vmatprep.subr.mxu0 %v3343_v22  ;;  %1622 = vmatpush1.msra.mxu1 %v1621_v62 }
 0x419   :  { %1223 = vmatpush1.msra.mxu0 %v3338_v16  ;;  %1628 = vmatprep.subr.mxu1 %v1627_v38  ;;  %v2136_v4 = vsub.f32 %v3448_v42, %v2135_v18  ;;  %v2142_v16 = vsub.f32 %v3458_v23, %v2141_v5 }
 0x41a   :  { %1256 = vmatprep.mubr.f32.mxu0 %v3188_v36  ;;  %1374 = vmatprep.subr.mxu0 %v1122_v21  ;;  %v2148_v21 = vsub.f32 %v3463_v12, %v2147_v11 }
 0x41b   :  { %1634 = vmatpush1.msra.mxu1 %v1633_v41  ;;  %1667 = vmatprep.mubr.f32.mxu1 %v3188_v36  ;;  %v2137_v22 = vand.u32 4294901760, %v2136_v4  ;;  %v3191_v4 = vmov 1983009808  }
 0x41c   :  { %1259 = vmatmul.mubr.f32.vlgmr.msra.gmra.mxu0 %v3399_v3  ;;  %1669 = vmatmul.mubr.f32.vlgmr.msra.gmra.mxu1 %v3394_v52  ;;  %v2149_v0 = vand.u32 4294901760, %v2148_v21 }
 0x41d   :  { %1378 = vmatpush1.msra.mxu0 %v1128_v10  ;;  %1785 = vmatprep.subr.mxu1 %v3364_v34  ;;  %v2154_v10 = vsub.f32 %v3473_v17, %v2153_v15 }
 0x41e   :  { %1382 = vmatprep.subr.mxu0 %v1134_v24  ;;  %1787 = vmatpush1.msra.mxu1 %v3367_v35  ;;  %v2143_v24 = vand.u32 4294901760, %v2142_v16 }
 0x41f   :  { %1386 = vmatpush1.msra.mxu0 %v1140_v25  ;;  %1789 = vmatprep.subr.mxu1 %v3370_v37  ;;  %v3513_v25 = vand.u32 4294901760, %v3254_v20  ;;  %v2155_v26 = vand.u32 4294901760, %v2154_v10 }
 0x420   :  { %1419 = vmatprep.mubr.f32.mxu0 %v3188_v36  ;;  %1532 = vmatprep.subr.mxu0 %v3364_v34 }
 0x421   :  { %1791 = vmatpush1.msra.mxu1 %v3374_v43  ;;  %1824 = vmatprep.mubr.f32.mxu1 %v3188_v36  ;;  %v3528_v28 = vsub.f32 %v3254_v20, %v3513_v25 }
 0x422   :  { %1421 = vmatmul.mubr.f32.vlgmr.msra.gmra.mxu0 %v3394_v52  ;;  %1828 = vmatmul.mubr.f32.vlgmr.msra.gmra.mxu1 %v3410_v55 }
 0x423   :  { %1534 = vmatpush1.msra.mxu0 %v3367_v35  ;;  %1947 = vmatprep.subr.mxu1 %v3364_v34  ;;  %v2626_v20 = vand.u32 4294901760, %v3528_v28  ;;  %v2633_v34 = vsub.f32 %v3538_v30, %v2632_v7 }
 0x424   :  { %1536 = vmatprep.subr.mxu0 %v3370_v37  ;;  %1949 = vmatpush1.msra.mxu1 %v3367_v35  ;;  %v2639_v35 = vsub.f32 %v3543_v31, %v2638_v32 }
 0x425   :  { %1538 = vmatpush1.msra.mxu0 %v3374_v43  ;;  %1951 = vmatprep.subr.mxu1 %v3370_v37  ;;  %v2627_v6 = vsub.f32 %v3528_v28, %v2626_v20 }
 0x426   :  { %1571 = vmatprep.mubr.f32.mxu0 %v3188_v36  ;;  %1705 = vmatprep.subr.mxu0 %v3378_v44  ;;  %v2634_v44 = vand.u32 4294901760, %v2633_v34 }
 0x427   :  { %1953 = vmatpush1.msra.mxu1 %v3374_v43  ;;  %1986 = vmatprep.mubr.f32.mxu1 %v3188_v36  ;;  %v2628_v37 = vand.u32 4294901760, %v2627_v6  ;;  %v2645_v43 = vsub.f32 %v3553_v19, %v2644_v33 }
 0x428   :  { %1577 = vmatmul.mubr.f32.vlgmr.msra.gmra.mxu0 %v3429_v61  ;;  %1988 = vmatmul.mubr.f32.vlgmr.msra.gmra.mxu1 %v3394_v52 }
 0x429   :  { %1708 = vmatpush1.msra.mxu0 %v3382_v45  ;;  %2138 = vmatprep.subr.mxu1 %v2137_v22  ;;  %v2640_v45 = vand.u32 4294901760, %v2639_v35 }
 0x42a   :  { %1711 = vmatprep.subr.mxu0 %v3386_v46  ;;  %2144 = vmatpush1.msra.mxu1 %v2143_v24  ;;  %v2646_v46 = vand.u32 4294901760, %v2645_v43 }
 0x42b   :  { %1714 = vmatpush1.msra.mxu0 %v3391_v50  ;;  %2150 = vmatprep.subr.mxu1 %v2149_v0 }
 0x42c   :  { %1747 = vmatprep.mubr.f32.mxu0 %v3188_v36  ;;  %1865 = vmatprep.subr.mxu0 %v1613_v14 }
 0x42d   :  { %2156 = vmatpush1.msra.mxu1 %v2155_v26  ;;  %2189 = vmatprep.mubr.f32.mxu1 %v3188_v36 }
 0x42e   :  { %1750 = vmatmul.mubr.f32.vlgmr.msra.gmra.mxu0 %v3399_v3  ;;  %2191 = vmatmul.mubr.f32.vlgmr.msra.gmra.mxu1 %v3394_v52 }
 0x42f   :  { %1869 = vmatpush1.msra.mxu0 %v1619_v13  ;;  %2307 = vmatprep.subr.mxu1 %v3433_v63 }
 0x430   :  { %1873 = vmatprep.subr.mxu0 %v1625_v53  ;;  %2309 = vmatpush1.msra.mxu1 %v3438_v40 }
 0x431   :  { %1877 = vmatpush1.msra.mxu0 %v1631_v54  ;;  %2311 = vmatprep.subr.mxu1 %v3442_v8 }
 0x432   :  { %1910 = vmatprep.mubr.f32.mxu0 %v3188_v36  ;;  %2054 = vmatprep.subr.mxu0 %v3433_v63 }
 0x433   :  { %2313 = vmatpush1.msra.mxu1 %v3451_v9  ;;  %2346 = vmatprep.mubr.f32.mxu1 %v3188_v36 }
 0x434   :  { %1912 = vmatmul.mubr.f32.vlgmr.msra.gmra.mxu0 %v3394_v52  ;;  %2350 = vmatmul.mubr.f32.vlgmr.msra.gmra.mxu1 %v3410_v55 }
 0x435   :  { %2056 = vmatpush1.msra.mxu0 %v3438_v40  ;;  %2469 = vmatprep.subr.mxu1 %v3433_v63 }
 0x436   :  { %2058 = vmatprep.subr.mxu0 %v3442_v8  ;;  %2471 = vmatpush1.msra.mxu1 %v3438_v40 }
 0x437   :  { %2060 = vmatpush1.msra.mxu0 %v3451_v9  ;;  %2473 = vmatprep.subr.mxu1 %v3442_v8 }
 0x438   :  { %2093 = vmatprep.mubr.f32.mxu0 %v3188_v36  ;;  %2227 = vmatprep.subr.mxu0 %v3448_v42 }
 0x439   :  { %2475 = vmatpush1.msra.mxu1 %v3451_v9  ;;  %2508 = vmatprep.mubr.f32.mxu1 %v3188_v36 }
 0x43a   :  { %2099 = vmatmul.mubr.f32.vlgmr.msra.gmra.mxu0 %v3429_v61  ;;  %2510 = vmatmul.mubr.f32.vlgmr.msra.gmra.mxu1 %v3394_v52 }
 0x43b   :  { %2230 = vmatpush1.msra.mxu0 %v3458_v23  ;;  %2629 = vmatprep.subr.mxu1 %v2628_v37 }
 0x43c   :  { %2233 = vmatprep.subr.mxu0 %v3463_v12  ;;  %2635 = vmatpush1.msra.mxu1 %v2634_v44 }
 0x43d   :  { %2236 = vmatpush1.msra.mxu0 %v3473_v17  ;;  %2641 = vmatprep.subr.mxu1 %v2640_v45 }
 0x43e   :  { %2269 = vmatprep.mubr.f32.mxu0 %v3188_v36  ;;  %2387 = vmatprep.subr.mxu0 %v2135_v18 }
 0x43f   :  { %2647 = vmatpush1.msra.mxu1 %v2646_v46  ;;  %2680 = vmatprep.mubr.f32.mxu1 %v3188_v36 }
 0x440   :  { %2272 = vmatmul.mubr.f32.vlgmr.msra.gmra.mxu0 %v3399_v3  ;;  %2682 = vmatmul.mubr.f32.vlgmr.msra.gmra.mxu1 %v3394_v52 }
 0x441   :  { %2391 = vmatpush1.msra.mxu0 %v2141_v5  ;;  %2798 = vmatprep.subr.mxu1 %v3513_v25 }
 0x442   :  { %2395 = vmatprep.subr.mxu0 %v2147_v11  ;;  %2800 = vmatpush1.msra.mxu1 %v3518_v1 }
 0x443   :  { %2399 = vmatpush1.msra.mxu0 %v2153_v15  ;;  %2802 = vmatprep.subr.mxu1 %v3522_v27  ;;  %v2001_v15 = vunpack.c.l.s4 %v3191_v4 }
 0x444   :  { %2432 = vmatprep.mubr.f32.mxu0 %v3188_v36  ;;  %2545 = vmatprep.subr.mxu0 %v3513_v25 }
 0x445   :  { %2804 = vmatpush1.msra.mxu1 %v3531_v29  ;;  %2837 = vmatprep.mubr.f32.mxu1 %v3188_v36 }
 0x446   :  { %2434 = vmatmul.mubr.f32.vlgmr.msra.gmra.mxu0 %v3394_v52  ;;  %2841 = vmatmul.mubr.f32.vlgmr.msra.gmra.mxu1 %v3410_v55 }
 0x447   :  { %2547 = vmatpush1.msra.mxu0 %v3518_v1  ;;  %2960 = vmatprep.subr.mxu1 %v3513_v25 }
 0x448   :  { %2549 = vmatprep.subr.mxu0 %v3522_v27  ;;  %2962 = vmatpush1.msra.mxu1 %v3518_v1  ;;  %v2002_v1 = vunpack.c.0.s8 %v2001_v15 }
 0x449   :  { %2551 = vmatpush1.msra.mxu0 %v3531_v29  ;;  %2964 = vmatprep.subr.mxu1 %v3522_v27 }
 0x44a   :  { %2584 = vmatprep.mubr.f32.mxu0 %v3188_v36  ;;  %2718 = vmatprep.subr.mxu0 %v3528_v28 }
 0x44b   :  { %2966 = vmatpush1.msra.mxu1 %v3531_v29  ;;  %2999 = vmatprep.mubr.f32.mxu1 %v3188_v36 }
 0x44c   :  { %2590 = vmatmul.mubr.f32.vlgmr.msra.gmra.mxu0 %v3429_v61  ;;  %3001 = vmatmul.mubr.f32.vlgmr.msra.gmra.mxu1 %v3394_v52 }
 0x44d   :  { %2721 = vmatpush1.msra.mxu0 %v3538_v30  ;;  %2760 = vmatprep.mubr.f32.mxu0 %v3188_v36 }
 0x44e   :  { %2724 = vmatprep.subr.mxu0 %v3543_v31 }
 0x44f   :  { %2727 = vmatpush1.msra.mxu0 %v3553_v19 }
 0x450   :  { %2878 = vmatprep.subr.mxu0 %v2626_v20  ;;  %2763 = vmatmul.mubr.f32.vlgmr.msra.gmra.mxu0 %v3399_v3  ;;  %v2005_v20 = vsub.s32 %v2002_v1, %v3275_v39 }
 0x451   :  { %2882 = vmatpush1.msra.mxu0 %v2632_v7  ;;  %2923 = vmatprep.mubr.f32.mxu0 %v3188_v36 }
 0x452   :  { %2886 = vmatprep.subr.mxu0 %v2638_v32 }
 0x453   :  { %2890 = vmatpush1.msra.mxu0 %v2644_v33 }
 0x454   :  { %2925 = vmatmul.mubr.f32.vlgmr.msra.gmra.mxu0 %v3394_v52 }
 0x4ce   :  { %v1179_v47 = vpop.f32.mrf.mxu1 }
 0x4d0   :  { %v1181_v48 = vpop.f32.mrf.mxu1 }
 0x4d2   :  { %v1338_v49 = vpop.f32.mrf.mxu1 }
 0x4d4   :  { %v1340_v50 = vpop.f32.mrf.mxu1 }
 0x4d6   :  { %v1087_v51 = vpop.f32.mrf.mxu0  ;;  %v1498_v14 = vpop.f32.mrf.mxu1 }
 0x4d7   :  { %v1180_v52 = vadd.f32 %v1179_v47, %v1087_v51 }
 0x4d8   :  { %v1089_v13 = vpop.f32.mrf.mxu0  ;;  %v1500_v53 = vpop.f32.mrf.mxu1 }
 0x4d9   :  { %v1182_v59 = vadd.f32 %v1181_v48, %v1089_v13 }
 0x4dc   :  { %v1260_v3 = vpop.f32.mrf.mxu0  ;;  %v1670_v2 = vpop.f32.mrf.mxu1 }
 0x4dd   :  { %v1261_v40 = vadd.f32 %v1260_v3, %v1180_v52 }
 0x4de   :  { %v1262_v54 = vpop.f32.mrf.mxu0  ;;  %v1672_v36 = vpop.f32.mrf.mxu1 }
 0x4df   :  { %v1263_v62 = vadd.f32 %v1262_v54, %v1182_v59  ;;  %v1339_v23 = vadd.f32 %v1338_v49, %v1261_v40 }
 0x4e1   :  { %v1341_v41 = vadd.f32 %v1340_v50, %v1263_v62 }
 0x4e2   :  { %v1422_v55 = vpop.f32.mrf.mxu0  ;;  %v1829_v56 = vpop.f32.mrf.mxu1 }
 0x4e3   :  { %v1423_v22 = vadd.f32 %v1422_v55, %v1339_v23 }
 0x4e4   :  { %v1424_v57 = vpop.f32.mrf.mxu0  ;;  %v1831_v58 = vpop.f32.mrf.mxu1 }
 0x4e5   :  { %v1425_v11 = vadd.f32 %v1424_v57, %v1341_v41  ;;  %v1499_v28 = vadd.f32 %v1498_v14, %v1423_v22 }
 0x4e7   :  { %v1501_v25 = vadd.f32 %v1500_v53, %v1425_v11 }
 0x4e8   :  { %v1578_v60 = vpop.f32.mrf.mxu0  ;;  %v1989_v61 = vpop.f32.mrf.mxu1 }
 0x4e9   :  { %v1671_v8 = vadd.f32 %v1670_v2, %v1578_v60  ;;  %v1998_v31 = vcombine.low %v1499_v28, %v1501_v25 }
 0x4ea   :  { %v1580_v38 = vpop.f32.mrf.mxu0  ;;  %v1991_v63 = vpop.f32.mrf.mxu1 }
 0x4eb   :  { %v1673_v12 = vadd.f32 %v1672_v36, %v1580_v38  ;;  %v2006_v35 = vrot.slane %v1998_v31, %v2005_v20 }
 0x4ee   :  { %v1751_v42 = vpop.f32.mrf.mxu0  ;;  %v2192_v9 = vpop.f32.mrf.mxu1 }
 0x4ef   :  { %v1752_v18 = vadd.f32 %v1751_v42, %v1671_v8 }
 0x4f0   :  { %v1753_v17 = vpop.f32.mrf.mxu0  ;;  %v2194_v5 = vpop.f32.mrf.mxu1 }
 0x4f1   :  { %v1754_v16 = vadd.f32 %v1753_v17, %v1673_v12  ;;  %v1830_v21 = vadd.f32 %v1829_v56, %v1752_v18 }
 0x4f3   :  { %v1832_v10 = vadd.f32 %v1831_v58, %v1754_v16 }
 0x4f4   :  { %v1913_v24 = vpop.f32.mrf.mxu0  ;;  %v2351_v0 = vpop.f32.mrf.mxu1 }
 0x4f5   :  { %v1914_v26 = vadd.f32 %v1913_v24, %v1830_v21 }
 0x4f6   :  { %v1915_v27 = vpop.f32.mrf.mxu0  ;;  %v2353_v30 = vpop.f32.mrf.mxu1 }
 0x4f7   :  { %v1916_v29 = vadd.f32 %v1915_v27, %v1832_v10  ;;  %v1990_v19 = vadd.f32 %v1989_v61, %v1914_v26 }
 0x4f9   :  { %v1992_v7 = vadd.f32 %v1991_v63, %v1916_v29 }
 0x4fa   :  { %v2100_v32 = vpop.f32.mrf.mxu0  ;;  %v2511_v33 = vpop.f32.mrf.mxu1 }
 0x4fb   :  { %v1999_v6 = vcombine.low %v1990_v19, %v1992_v7  ;;  %v2193_v14 = vadd.f32 %v2192_v9, %v2100_v32 }
 0x4fc   :  { %v2102_v34 = vpop.f32.mrf.mxu0  ;;  %v2513_v44 = vpop.f32.mrf.mxu1 }
 0x4fd   :  { %v2013_v37 = vrot.slane %v1999_v6, %v2005_v20  ;;  %v2195_v49 = vadd.f32 %v2194_v5, %v2102_v34 }
 0x4ff   :  { %v2014_v43 = vcombine.low %v2006_v35, %v2013_v37 }
 0x500   :  { %v2273_v45 = vpop.f32.mrf.mxu0  ;;  %v2683_v47 = vpop.f32.mrf.mxu1 }
 0x501   :  { %2016 = vst [vmem:[#allocation5] sm:$0xff] %v2014_v43  ;;  %v2274_v13 = vadd.f32 %v2273_v45, %v2193_v14 }
 0x502   :  { %v2275_v46 = vpop.f32.mrf.mxu0  ;;  %v2685_v50 = vpop.f32.mrf.mxu1 }
 0x503   :  { %v2276_v39 = vadd.f32 %v2275_v46, %v2195_v49  ;;  %v2352_v36 = vadd.f32 %v2351_v0, %v2274_v13 }
 0x505   :  { %v2354_v2 = vadd.f32 %v2353_v30, %v2276_v39 }
 0x506   :  { %v2435_v48 = vpop.f32.mrf.mxu0  ;;  %v2842_v53 = vpop.f32.mrf.mxu1 }
 0x507   :  { %v2436_v52 = vadd.f32 %v2435_v48, %v2352_v36 }
 0x508   :  { %v2437_v51 = vpop.f32.mrf.mxu0  ;;  %v2844_v56 = vpop.f32.mrf.mxu1 }
 0x509   :  { %v2438_v58 = vadd.f32 %v2437_v51, %v2354_v2  ;;  %v2512_v23 = vadd.f32 %v2511_v33, %v2436_v52 }
 0x50b   :  { %v2514_v41 = vadd.f32 %v2513_v44, %v2438_v58 }
 0x50c   :  { %v2591_v3 = vpop.f32.mrf.mxu0  ;;  %v3002_v63 = vpop.f32.mrf.mxu1 }
 0x50d   :  { %v2684_v55 = vadd.f32 %v2683_v47, %v2591_v3  ;;  %v3011_v17 = vcombine.low %v2512_v23, %v2514_v41 }
 0x50e   :  { %v2593_v54 = vpop.f32.mrf.mxu0  ;;  %v3004_v18 = vpop.f32.mrf.mxu1 }
 0x50f   :  { %v2686_v59 = vadd.f32 %v2685_v50, %v2593_v54  ;;  %v3019_v15 = vrot.slane %v3011_v17, %v2005_v20 }
 0x510   :  { %v2764_v57 = vpop.f32.mrf.mxu0 }
 0x511   :  { %v2765_v60 = vadd.f32 %v2764_v57, %v2684_v55 }
 0x512   :  { %v2766_v61 = vpop.f32.mrf.mxu0 }
 0x513   :  { %v2767_v62 = vadd.f32 %v2766_v61, %v2686_v59  ;;  %v2843_v38 = vadd.f32 %v2842_v53, %v2765_v60 }
 0x514   :  { %v2926_v40 = vpop.f32.mrf.mxu0 }
 0x515   :  { %v2927_v8 = vadd.f32 %v2926_v40, %v2843_v38  ;;  %v2845_v42 = vadd.f32 %v2844_v56, %v2767_v62 }
 0x516   :  { %v2928_v9 = vpop.f32.mrf.mxu0 }
 0x517   :  { %v2929_v12 = vadd.f32 %v2928_v9, %v2845_v42  ;;  %v3003_v5 = vadd.f32 %v3002_v63, %v2927_v8 }
 0x519   :  { %v3005_v11 = vadd.f32 %v3004_v18, %v2929_v12 }
 0x51b   :  { %v3012_v4 = vcombine.low %v3003_v5, %v3005_v11 }
 0x51d   :  { %v3026_v16 = vrot.slane %v3012_v4, %v2005_v20 }
 0x51f   :  { %v3027_v21 = vcombine.low %v3019_v15, %v3026_v16 }
 0x521   :  { %3029 = vst [vmem:[#allocation5 + $0x8] sm:$0xff] %v3027_v21 }
 0x522   :  { %3172 = shalt.err (!%p3169_p9)
}
 0x523   :  { %3039 = dma.vmem_to_hbm [thread:$0]  %s3037_s22, 256, %s3652_s3, [#allocation4]  }
 0x524   :  { %3183 = dma.done.wait [#allocation4], 256  }
 0x525   :  { %3184 = vsyncadd [#allocation4], 4294967040 }
 0x526   :  { %3043 = vsyncpa [#allocation3], 1 }
 0x527   :  { %3044 = vsyncpa [#allocation4], 1 }

</bundles_post_ra>
